<compile_context>
chip_gen: v7x
topology: tpu7x:2x2x1
jax: 0.10.0
libtpu: 0.0.40
codegen_flags: <defaults>
</compile_context>

<pallas_src>
import functools

import jax
import jax.numpy as jnp
import numpy as np
from jax.experimental import pallas as pl
from jax.experimental.pallas import tpu as pltpu


# ----------------------------------------------------------------------------
# Fused MLP kernel: all layers for one [C0, tile_p] tile of points.
# ----------------------------------------------------------------------------
def _fused_mlp_kernel(*refs, n_layers, no_residual, last_op, couts):
    # refs = (x_ref, b_ref, [w_skip_all_ref], w_0, ..., w_{L-1}, o_ref)
    #   x_ref       : [C0, TP]            (stream dtype; points on lanes)
    #   b_ref       : [sum(couts), 1]     f32, all biases stacked
    #   w_skip_all  : [sum(couts[1:]), C0] stream dtype (only if residual path)
    #   w_l         : [Cout_l, Cprev_l]   stream dtype
    #   o_ref       : [Cout_last, TP]
    x_ref = refs[0]
    b_ref = refs[1]
    o_ref = refs[-1]
    has_skip = (not no_residual) and n_layers > 1
    if has_skip:
        ws_ref = refs[2]
        w_refs = refs[3:-1]
    else:
        ws_ref = None
        w_refs = refs[2:-1]
    assert len(w_refs) == n_layers

    dot_dtype = x_ref.dtype                       # bf16 (default) or f32
    x0 = x_ref[...]                               # [C0, TP], stays on-chip
    b_all = b_ref[...].astype(jnp.float32)        # [sum_cout, 1]

    # One well-shaped matmul for every skip branch (instead of L-1 tiny dots).
    if has_skip:
        s_all = jnp.dot(ws_ref[...], x0, preferred_element_type=jnp.float32)

    y = x0
    b_off = 0
    s_off = 0
    for l in range(n_layers):
        cout = couts[l]
        acc = jnp.dot(w_refs[l][...], y, preferred_element_type=jnp.float32)
        if has_skip and l > 0:
            acc = acc + s_all[s_off:s_off + cout, :]
            s_off += cout
        acc = acc + b_all[b_off:b_off + cout, :]   # bias broadcasts on lanes
        b_off += cout
        if l != n_layers - 1:
            acc = jnp.where(acc > 0, acc, jnp.float32(0.01) * acc)  # leaky_relu
            y = acc.astype(dot_dtype)              # bf16 hand-off to next dot
        else:
            if last_op == "sigmoid":
                acc = jax.nn.sigmoid(acc)          # EUP, effectively free
            o_ref[...] = acc.astype(o_ref.dtype)


# ----------------------------------------------------------------------------
# Wrapper: layout/padding glue only; all math inside the kernel.
# ----------------------------------------------------------------------------
def _round128(v):
    return max(128, (int(v) // 128) * 128)


def surface_classifier_forward(feature, params, *, no_residual, last_op,
                               stream_dtype=jnp.bfloat16, tile_p=None,
                               vmem_budget_bytes=24 * 1024 * 1024):
    """
    feature: [B, C_in, N]
    params:  list of torch-style (w [Cout, Cin_total], b [Cout]) per layer
    returns: [B, C_out, N] float32
    """
    B, C0, N = feature.shape
    n_layers = len(params)
    couts = tuple(int(w.shape[0]) for (w, _) in params)
    cout_last = couts[-1]
    total_cout = sum(couts)
    has_skip = (not no_residual) and n_layers > 1

    # ---- split / stack parameters into kernel layout -------------------------
    w_main, w_skip_rows, b_rows = [], [], []
    for l, (w, b) in enumerate(params):
        b_rows.append(jnp.asarray(b).reshape(-1, 1).astype(jnp.float32))
        if has_skip and l > 0:
            c_prev = int(w.shape[1]) - C0
            w_main.append(jnp.asarray(w[:, :c_prev]).astype(stream_dtype))
            w_skip_rows.append(jnp.asarray(w[:, c_prev:]).astype(stream_dtype))
        else:
            w_main.append(jnp.asarray(w).astype(stream_dtype))
    b_all = jnp.concatenate(b_rows, axis=0)                       # [sum_cout, 1]
    w_skip_all = jnp.concatenate(w_skip_rows, axis=0) if has_skip else None

    # ---- point-tile selection -------------------------------------------------
    max_width = max([C0] + [int(w.shape[0]) for w, _ in params]
                    + [int(w.shape[1]) for w, _ in params])
    if tile_p is None:
        if max_width <= 64:
            tile_p = 8192          # narrow nets: amortize per-step overhead
        elif max_width <= 256:
            tile_p = 4096
        else:
            tile_p = 2048          # production-wide nets (also v7x-safe)
    tile_p = _round128(tile_p)
    tile_p = min(tile_p, _round128(pl.cdiv(N, 128) * 128))
    # Keep >= ~4 grid steps so the parallel axes can shard across 2 TCs (v7x).
    while tile_p > 512 and B * pl.cdiv(N, tile_p) < 4:
        tile_p = _round128(tile_p // 2)

    # Rough VMEM footprint (double-buffered I/O blocks + resident weights +
    # live activations); shrink tile until it fits the budget.
    sdt = jnp.dtype(stream_dtype).itemsize
    sum_skip = int(w_skip_all.shape[0]) if has_skip else 0
    w_bytes = (sum(int(np.prod(w.shape)) for w in w_main) * sdt
               + sum_skip * C0 * sdt + total_cout * 4)

    def _vmem_est(tp):
        io = 2 * C0 * tp * sdt + 2 * cout_last * tp * 4
        act = tp * (C0 * sdt + sum_skip * 4 + 2 * max_width * 4)
        return io + act + w_bytes

    while tile_p > 128 and _vmem_est(tile_p) > vmem_budget_bytes:
        tile_p = _round128(tile_p // 2)

    # ---- pad points once (N axis only), keep native [B, C, N] layout ---------
    n_pad = pl.cdiv(N, tile_p) * tile_p
    x = feature.astype(stream_dtype)
    if n_pad != N:
        x = jnp.pad(x, ((0, 0), (0, 0), (0, n_pad - N)))

    vmem_spec = pl.BlockSpec(memory_space=pltpu.MemorySpace.VMEM)
    in_specs = [pl.BlockSpec((pl.Squeezed(), C0, tile_p),
                             lambda b, i: (b, 0, i)),
                vmem_spec]                              # b_all
    args = [x, b_all]
    if has_skip:
        in_specs.append(vmem_spec)
        args.append(w_skip_all)
    in_specs += [vmem_spec] * n_layers
    args += w_main

    flops = 2 * B * n_pad * sum(int(w.shape[0]) * int(w.shape[1])
                                for w, _ in params)
    transcendentals = B * n_pad * cout_last if last_op == "sigmoid" else 0
    bytes_accessed = int(B * n_pad * (C0 * sdt + cout_last * 4) + w_bytes)

    out = pl.pallas_call(
        functools.partial(_fused_mlp_kernel, n_layers=n_layers,
                          no_residual=no_residual, last_op=last_op,
                          couts=couts),
        out_shape=jax.ShapeDtypeStruct((B, cout_last, n_pad), jnp.float32),
        grid_spec=pltpu.PrefetchScalarGridSpec(
            num_scalar_prefetch=0,
            grid=(B, n_pad // tile_p),
            in_specs=in_specs,
            out_specs=pl.BlockSpec((pl.Squeezed(), cout_last, tile_p),
                                   lambda b, i: (b, 0, i)),
        ),
        compiler_params=pltpu.CompilerParams(
            dimension_semantics=("parallel", "parallel"),
            vmem_limit_bytes=48 * 1024 * 1024),
        cost_estimate=pl.CostEstimate(
            flops=flops, transcendentals=transcendentals,
            bytes_accessed=bytes_accessed),
    )(*args)

    if n_pad != N:
        out = out[:, :, :N]
    return out


# ----------------------------------------------------------------------------
# Deterministic parameter construction (mirrors nn.Conv1d shapes/init ranges).
# ----------------------------------------------------------------------------
def make_params(filter_channels, no_residual, key):
    params = []
    for l in range(len(filter_channels) - 1):
        if no_residual or l == 0:
            cin = filter_channels[l]
        else:
            cin = filter_channels[l] + filter_channels[0]
        cout = filter_channels[l + 1]
        key, kw, kb = jax.random.split(key, 3)
        bound = 1.0 / np.sqrt(cin)  # torch Conv1d default uniform bound (k=1)
        w = jax.random.uniform(kw, (cout, cin), jnp.float32, -bound, bound)
        b = jax.random.uniform(kb, (cout,), jnp.float32, -bound, bound)
        params.append((w, b))
    return params


# ----------------------------------------------------------------------------
# Pure-JAX reference (literal translation of the PyTorch forward, with concat).
# ----------------------------------------------------------------------------
def reference_forward(feature, params, *, no_residual, last_op):
    y = feature
    tmpy = feature
    n = len(params)
    for i, (w, b) in enumerate(params):
        x_in = y if (no_residual or i == 0) else jnp.concatenate([y, tmpy], 1)
        y = jnp.einsum('oc,bcn->bon', w, x_in) + b[None, :, None]
        if i != n - 1:
            y = jnp.where(y > 0, y, 0.01 * y)
    if last_op == "sigmoid":
        y = jax.nn.sigmoid(y)
    return y


if __name__ == "__main__":
    key = jax.random.PRNGKey(0)
    filter_channels = [4, 32, 16, 1]
    B, N = 2, 16

    for no_residual, last_op in [(False, "sigmoid"), (True, None)]:
        key, kf, kp = jax.random.split(key, 3)
        feature = jax.random.normal(kf, (B, filter_channels[0], N), jnp.float32)
        params = make_params(filter_channels, no_residual, kp)

        ref = jax.block_until_ready(
            reference_forward(feature, params,
                              no_residual=no_residual, last_op=last_op))

        # Exact f32 stream path: verifies kernel logic at tight tolerance.
        out32 = surface_classifier_forward(
            feature, params, no_residual=no_residual, last_op=last_op,
            stream_dtype=jnp.float32)
        out32 = jax.block_until_ready(out32)
        assert out32.shape == (B, filter_channels[-1], N), out32.shape
        np.testing.assert_allclose(np.asarray(out32), np.asarray(ref),
                                   rtol=1e-5, atol=1e-5)

        # Default bf16 stream path (perf configuration): looser tolerance.
        out16 = surface_classifier_forward(
            feature, params, no_residual=no_residual, last_op=last_op)
        out16 = jax.block_until_ready(out16)
        assert out16.shape == (B, filter_channels[-1], N), out16.shape
        np.testing.assert_allclose(np.asarray(out16), np.asarray(ref),
                                   rtol=5e-2, atol=5e-2)

    print("KERNEL_OK")
</pallas_src>

<mosaic_0001>
module attributes {stable_mosaic.version = 11 : i64} {
  func.func @_fused_mlp_kernel(%arg0: i32, %arg1: i32, %arg2: memref<1x4x128xf32, #tpu.memory_space<vmem>>, %arg3: memref<49x1xf32, #tpu.memory_space<vmem>>, %arg4: memref<17x4xf32, #tpu.memory_space<vmem>>, %arg5: memref<32x4xf32, #tpu.memory_space<vmem>>, %arg6: memref<16x32xf32, #tpu.memory_space<vmem>>, %arg7: memref<1x16xf32, #tpu.memory_space<vmem>>, %arg8: memref<1x1x128xf32, #tpu.memory_space<vmem>>) attributes {dimension_semantics = [#tpu.dimension_semantics<parallel>, #tpu.dimension_semantics<parallel>], iteration_bounds = array<i64: 2, 1>, scalar_prefetch = 0 : i64, scratch_operands = 0 : i64, tpu.core_type = #tpu.core_type<tc>, window_params = [{transform_indices = @transform_0, window_bounds = array<i64: 1, 4, 128>}, {pipeline_mode = #tpu.pipeline_mode<synchronous>, transform_indices = @transform_1, window_bounds = array<i64: 49, 1>}, {pipeline_mode = #tpu.pipeline_mode<synchronous>, transform_indices = @transform_2, window_bounds = array<i64: 17, 4>}, {pipeline_mode = #tpu.pipeline_mode<synchronous>, transform_indices = @transform_3, window_bounds = array<i64: 32, 4>}, {pipeline_mode = #tpu.pipeline_mode<synchronous>, transform_indices = @transform_4, window_bounds = array<i64: 16, 32>}, {pipeline_mode = #tpu.pipeline_mode<synchronous>, transform_indices = @transform_5, window_bounds = array<i64: 1, 16>}, {transform_indices = @transform_6, window_bounds = array<i64: 1, 1, 128>}]} {
    %c0 = arith.constant 0 : index
    %c0_0 = arith.constant 0 : index
    %c0_1 = arith.constant 0 : index
    %0 = vector.load %arg2[%c0, %c0_0, %c0_1] : memref<1x4x128xf32, #tpu.memory_space<vmem>>, vector<1x4x128xf32>
    %1 = vector.shape_cast %0 : vector<1x4x128xf32> to vector<4x128xf32>
    %c0_2 = arith.constant 0 : index
    %c0_3 = arith.constant 0 : index
    %2 = vector.load %arg3[%c0_2, %c0_3] : memref<49x1xf32, #tpu.memory_space<vmem>>, vector<49x1xf32>
    %c0_4 = arith.constant 0 : index
    %c0_5 = arith.constant 0 : index
    %3 = vector.load %arg4[%c0_4, %c0_5] : memref<17x4xf32, #tpu.memory_space<vmem>>, vector<17x4xf32>
    %cst = arith.constant dense<0.000000e+00> : vector<17x128xf32>
    %4 = tpu.matmul %3, %1, %cst {dimension_numbers = #tpu.dot_dimension_numbers<[1], [0], [0], [1], [0, 0, 1, 1], [], []>} : vector<17x4xf32>, vector<4x128xf32>, vector<17x128xf32> -> vector<17x128xf32>
    %c0_6 = arith.constant 0 : index
    %c0_7 = arith.constant 0 : index
    %5 = vector.load %arg5[%c0_6, %c0_7] : memref<32x4xf32, #tpu.memory_space<vmem>>, vector<32x4xf32>
    %cst_8 = arith.constant dense<0.000000e+00> : vector<32x128xf32>
    %6 = tpu.matmul %5, %1, %cst_8 {dimension_numbers = #tpu.dot_dimension_numbers<[1], [0], [0], [1], [0, 0, 1, 1], [], []>} : vector<32x4xf32>, vector<4x128xf32>, vector<32x128xf32> -> vector<32x128xf32>
    %7 = vector.extract_strided_slice %2 {offsets = [0, 0], sizes = [32, 1], strides = [1, 1]} : vector<49x1xf32> to vector<32x1xf32>
    %8 = vector.broadcast %7 : vector<32x1xf32> to vector<32x128xf32>
    %9 = arith.addf %6, %8 : vector<32x128xf32>
    %cst_9 = arith.constant 0.000000e+00 : f32
    %10 = vector.broadcast %cst_9 : f32 to vector<32x128xf32>
    %11 = arith.cmpf ogt, %9, %10 : vector<32x128xf32>
    %cst_10 = arith.constant 0.00999999977 : f32
    %12 = vector.broadcast %cst_10 : f32 to vector<32x128xf32>
    %13 = arith.mulf %12, %9 : vector<32x128xf32>
    %14 = arith.select %11, %9, %13 : vector<32x128xi1>, vector<32x128xf32>
    %c0_11 = arith.constant 0 : index
    %c0_12 = arith.constant 0 : index
    %15 = vector.load %arg6[%c0_11, %c0_12] : memref<16x32xf32, #tpu.memory_space<vmem>>, vector<16x32xf32>
    %cst_13 = arith.constant dense<0.000000e+00> : vector<16x128xf32>
    %16 = tpu.matmul %15, %14, %cst_13 {dimension_numbers = #tpu.dot_dimension_numbers<[1], [0], [0], [1], [0, 0, 1, 1], [], []>} : vector<16x32xf32>, vector<32x128xf32>, vector<16x128xf32> -> vector<16x128xf32>
    %17 = vector.extract_strided_slice %4 {offsets = [0, 0], sizes = [16, 128], strides = [1, 1]} : vector<17x128xf32> to vector<16x128xf32>
    %18 = arith.addf %16, %17 : vector<16x128xf32>
    %19 = vector.extract_strided_slice %2 {offsets = [32, 0], sizes = [16, 1], strides = [1, 1]} : vector<49x1xf32> to vector<16x1xf32>
    %20 = vector.broadcast %19 : vector<16x1xf32> to vector<16x128xf32>
    %21 = arith.addf %18, %20 : vector<16x128xf32>
    %cst_14 = arith.constant 0.000000e+00 : f32
    %22 = vector.broadcast %cst_14 : f32 to vector<16x128xf32>
    %23 = arith.cmpf ogt, %21, %22 : vector<16x128xf32>
    %cst_15 = arith.constant 0.00999999977 : f32
    %24 = vector.broadcast %cst_15 : f32 to vector<16x128xf32>
    %25 = arith.mulf %24, %21 : vector<16x128xf32>
    %26 = arith.select %23, %21, %25 : vector<16x128xi1>, vector<16x128xf32>
    %c0_16 = arith.constant 0 : index
    %c0_17 = arith.constant 0 : index
    %27 = vector.load %arg7[%c0_16, %c0_17] : memref<1x16xf32, #tpu.memory_space<vmem>>, vector<1x16xf32>
    %cst_18 = arith.constant dense<0.000000e+00> : vector<1x128xf32>
    %28 = tpu.matmul %27, %26, %cst_18 {dimension_numbers = #tpu.dot_dimension_numbers<[1], [0], [0], [1], [0, 0, 1, 1], [], []>} : vector<1x16xf32>, vector<16x128xf32>, vector<1x128xf32> -> vector<1x128xf32>
    %29 = vector.extract_strided_slice %4 {offsets = [16, 0], sizes = [1, 128], strides = [1, 1]} : vector<17x128xf32> to vector<1x128xf32>
    %30 = arith.addf %28, %29 : vector<1x128xf32>
    %31 = vector.extract_strided_slice %2 {offsets = [48, 0], sizes = [1, 1], strides = [1, 1]} : vector<49x1xf32> to vector<1x1xf32>
    %32 = vector.broadcast %31 : vector<1x1xf32> to vector<1x128xf32>
    %33 = arith.addf %30, %32 : vector<1x128xf32>
    %34 = arith.negf %33 : vector<1x128xf32>
    %35 = math.exp %34 : vector<1x128xf32>
    %cst_19 = arith.constant 1.000000e+00 : f32
    %36 = vector.broadcast %cst_19 : f32 to vector<1x128xf32>
    %37 = arith.addf %36, %35 : vector<1x128xf32>
    %38 = arith.divf %36, %37 : vector<1x128xf32>
    %c0_20 = arith.constant 0 : index
    %c0_21 = arith.constant 0 : index
    %c0_22 = arith.constant 0 : index
    %39 = vector.load %arg8[%c0_20, %c0_21, %c0_22] : memref<1x1x128xf32, #tpu.memory_space<vmem>>, vector<1x1x128xf32>
    %40 = vector.shape_cast %39 : vector<1x1x128xf32> to vector<1x128xf32>
    %41 = vector.shape_cast %38 : vector<1x128xf32> to vector<1x1x128xf32>
    tpu.vector_store %arg8[%c0_20, %c0_21, %c0_22], %41 {strides = array<i32>} : memref<1x1x128xf32, #tpu.memory_space<vmem>>, vector<1x1x128xf32>,
    return
  }
  func.func @transform_0(%arg0: i32, %arg1: i32) -> (i32, i32, i32) {
    %c0_i32 = arith.constant 0 : i32
    %c0_i32_0 = arith.constant 0 : i32
    return %arg0, %c0_i32, %arg1 : i32, i32, i32
  }
  func.func @transform_1(%arg0: i32, %arg1: i32) -> (i32, i32) {
    %c0_i32 = arith.constant 0 : i32
    %c0_i32_0 = arith.constant 0 : i32
    %c0_i32_1 = arith.constant 0 : i32
    return %c0_i32, %c0_i32_0 : i32, i32
  }
  func.func @transform_2(%arg0: i32, %arg1: i32) -> (i32, i32) {
    %c0_i32 = arith.constant 0 : i32
    %c0_i32_0 = arith.constant 0 : i32
    %c0_i32_1 = arith.constant 0 : i32
    return %c0_i32, %c0_i32_0 : i32, i32
  }
  func.func @transform_3(%arg0: i32, %arg1: i32) -> (i32, i32) {
    %c0_i32 = arith.constant 0 : i32
    %c0_i32_0 = arith.constant 0 : i32
    %c0_i32_1 = arith.constant 0 : i32
    return %c0_i32, %c0_i32_0 : i32, i32
  }
  func.func @transform_4(%arg0: i32, %arg1: i32) -> (i32, i32) {
    %c0_i32 = arith.constant 0 : i32
    %c0_i32_0 = arith.constant 0 : i32
    %c0_i32_1 = arith.constant 0 : i32
    return %c0_i32, %c0_i32_0 : i32, i32
  }
  func.func @transform_5(%arg0: i32, %arg1: i32) -> (i32, i32) {
    %c0_i32 = arith.constant 0 : i32
    %c0_i32_0 = arith.constant 0 : i32
    %c0_i32_1 = arith.constant 0 : i32
    return %c0_i32, %c0_i32_0 : i32, i32
  }
  func.func @transform_6(%arg0: i32, %arg1: i32) -> (i32, i32, i32) {
    %c0_i32 = arith.constant 0 : i32
    %c0_i32_0 = arith.constant 0 : i32
    return %arg0, %c0_i32, %arg1 : i32, i32, i32
  }
}

</mosaic_0001>

<bundles_post_ra>
// kernel: tpu_custom_call.1
= control target key start
LH: loop header
LB: loop body
LE: loop exit
PB: predicated region body
PF: predicated region fallthrough
CT: control target
= control target key end

     0   :  { %11 = vsyncpa [#allocation3], 0  ;;  %s1232_s0 = inlined_call_operand.vmem [shape: f32[2,4,128], index: 0, kind: input, shape index: {}]   ;;  %s1233_s1 = inlined_call_operand.vmem [shape: f32[49,1], index: 1, kind: input, shape index: {}]   ;;  %s1234_s2 = inlined_call_operand.vmem [shape: f32[17,4], index: 2, kind: input, shape index: {}]   ;;  %s1235_s3 = inlined_call_operand.vmem [shape: f32[32,4], index: 3, kind: input, shape index: {}]   ;;  %s1236_s4 = inlined_call_operand.vmem [shape: f32[16,32], index: 4, kind: input, shape index: {}]   ;;  %s1237_s5 = inlined_call_operand.vmem [shape: f32[1,16], index: 5, kind: input, shape index: {}]   ;;  %s1238_s6 = inlined_call_operand.hbm [shape: f32[2,1,128], index: 6, kind: output, shape index: {}]  }
   0x1   :  { %13 = vsyncpa [#allocation3 + $0x1], 0  ;;  %s1053_s21 = smov 0   ;;  %s1055_s22 = smov 0  }
   0x2   :  { %s1057_s23 = smov 0   ;;  %s1059_s24 = smov 0  }
   0x3   :  { %s1061_s25 = smov 0   ;;  %s1063_s26 = smov 0  }
   0x4 LB: > { %s780_s27 = sadd.s32 4294967295, %s1011_s26   ;;  %s781_s28 = sadd.s32 4294967294, %s1011_s26   ;;  %s1011_s26 = sphi %s1063_s26, %s19_s26   ;;  %s1007_s25 = sphi %s1061_s25, %s1245_s25   ;;  %s1003_s24 = sphi %s1059_s24, %s1244_s24   ;;  %s999_s23 = sphi %s1057_s23, %s1243_s23   ;;  %s995_s22 = sphi %s1055_s22, %s1242_s22   ;;  %s991_s21 = sphi %s1053_s21, %s1241_s21  }
   0x5   : > { %s31_s29 = sadd.s32 1, %s1007_s25  ;;  %s173_s30 = sadd.s32 1, %s999_s23 }
   0x6   : > { %p33_p0 = scmp.ge.s32.totalorder %s31_s29, 2  ;;  %p183_p1 = scmp.ne.s32.totalorder %s999_s23, %s995_s22 }
   0x7   : > { %p184_p2 = scmp.eq.s32.totalorder %s780_s27, 1  ;;  %p189_p3 = scmp.ne.s32.totalorder %s995_s22, %s991_s21 }
   0x8   : > { %s1247_s29 = smov (%p33_p0, %s31_s29), 0  ;;  %p190_p5 = scmp.eq.s32.totalorder %s781_s28, 1 }
   0x9   : > { %p1093_p4 = por %p184_p2, %p183_p1  ;;  %s168_s8 = ssub.s32 %s1007_s25, %s1247_s29 }
   0xa   : > { %p784_p6 = scmp.ge.s32.totalorder %s1011_s26, 1  ;;  %p171_p7 = scmp.eq.s32.totalorder %s168_s8, 0 }
   0xb   : > { %p1100_p8 = por %p190_p5, %p189_p3  ;;  %p233_p9 = scmp.lt.s32.totalorder %s1011_s26, 3 }
   0xc   : > { %s1106_s10 = scalar_select %p171_p7, %s999_s23, %s173_s30  }
   0xd   : > { %p234_p10 = pnand %p784_p6, %p233_p9 }
   0xe   : > { %p264_p11 = scmp.lt.s32.totalorder (!%p234_p10), %s1003_s24, 1  ;;  %vm282_vm0 = vcmask (!%p234_p10), 31744   ;;  %v376_v0 = vld [vmem:[%s1235_s3] sm:$0xff] (!%p234_p10)  ;;  %v1013_v2 = vmov (!%p234_p10), 0   ;;  %v274_v3 = vld [vmem:[%s1233_s1 + $0x10] sm:$0xff] (!%p234_p10)  ;;  %vm292_vm1 = vcmask (!%p234_p10), 1043456  }
   0xf   : > { %237 = sbr.rel (%p234_p10) target bundleno = 738 (0x2e2), region = 44  ;;  %833 = vmatprep.mubr.msk.f32.mxu1 (!%p234_p10), %vm282_vm0, %v376_v0  ;;  %v272_v1 = vld [vmem:[%s1233_s1] sm:$0xff] (!%p234_p10)  ;;  %927 = vset.pattern.permute.xlu0 (!%p234_p10), %v1013_v2  ;;  %v273_v4 = vld [vmem:[%s1233_s1 + $0x8] sm:$0xff] (!%p234_p10)  ;;  %v275_v5 = vld [vmem:[%s1233_s1 + $0x18] sm:$0xff] (!%p234_p10)  ;;  %v1014_v14 = vmov (!%p234_p10), 0.0   ;;  %vm1015_vm2 = vmmov (!%p234_p10), 0  }
  0x10   : > { %928 = vset.pattern.permute.xlu1 (!%p234_p10), %v1013_v2  ;;  %382 = vperm.xlu0 (!%p234_p10), %927, %v272_v1   ;;  %v377_v7 = vld [vmem:[%s1235_s3 + $0x8] sm:$0xff] (!%p234_p10)  ;;  %v378_v8 = vld [vmem:[%s1235_s3 + $0x10] sm:$0xff] (!%p234_p10)  ;;  %v276_v9 = vld [vmem:[%s1233_s1 + $0x20] sm:$0xff] (!%p234_p10)  ;;  %vm511_vm3 = vcmask (!%p234_p10), 261120   ;;  %v1016_v45 = vmov (!%p234_p10), 0.0|0.0   ;;  %vm612_vm10 = vcmask (!%p234_p10), 130048  }
  0x11   : > { %392 = vperm.xlu1 (!%p234_p10), %928, %v274_v3   ;;  %v277_v10 = vld [vmem:[%s1233_s1 + $0x28] sm:$0xff] (!%p234_p10)  ;;  %v379_v11 = vld [vmem:[%s1235_s3 + $0x18] sm:$0xff] (!%p234_p10)  ;;  %v278_v12 = vld [vmem:[%s1233_s1 + $0x30] sm:$0x1] (!%p234_p10)  ;;  %820 = vmatprep.subr.mxu0 (!%p234_p10), %v1014_v14  ;;  %s262_s28 = sand.u32 (!%p234_p10), 1, %s995_s22  }
  0x12   : > { %v279_v13 = vld [vmem:[%s1234_s2] sm:$0xff] (!%p234_p10)  ;;  %822 = vmatprep.mubr.msk.f32.mxu0 (!%p234_p10), %vm1015_vm2, %v1014_v14  ;;  %v280_v16 = vld [vmem:[%s1234_s2 + $0x8] sm:$0xff] (!%p234_p10)  ;;  %v281_v44 = vld [vmem:[%s1234_s2 + $0x10] sm:$0x1] (!%p234_p10)  ;;  %s263_s8 = scalar_lea.vmem (!%p234_p10), [#allocation2], %s262_s28 }
  0x13   : > { %v509_v15 = vld [vmem:[%s1236_s4] sm:$0xff] (!%p234_p10)  ;;  %v510_v39 = vld [vmem:[%s1236_s4 + $0x8] sm:$0xff] (!%p234_p10)  ;;  %s713_s11 = sshll.u32 (!%p234_p10), %s263_s8, 4  ;;  %s1187_s11 = int_to_ptr.vmem [resolvable:$true] %s713_s11 }
  0x14   : > { %387 = vperm.xlu0 (!%p234_p10), %927, %v273_v4   ;;  %v611_v59 = vld [vmem:[%s1237_s5] sm:$0x1] (!%p234_p10)  ;;  %s933_s16 = scalar_lea.vmem (!%p234_p10), %s1187_s11, 16 }
  0x15   : > { %397 = vperm.xlu1 (!%p234_p10), %928, %v275_v5   ;;  %p934_p12 = scmp.ne.s32.totalorder (!%p234_p10), %s1187_s11, %s933_s16 }
  0x16   : > { %s265_s15 = scalar_select %p264_p11, %s1003_s24, 1 }
  0x17   : > { %p935_p13 = pnand %p934_p12, %p1093_p4 }
  0x18   : > { %s785_s18 = sshll.u32 %s265_s15, 2  ;;  %595 = vperm.xlu0 %927, %v276_v9   ;;  %s700_s15 = scalar_lea.sflag [#allocation3], %s262_s28 }
  0x19   : > { %s270_s30 = scalar_lea.vmem %s1232_s0, %s785_s18  ;;  %600 = vperm.xlu1 %928, %v277_v10   ;;  %p936_p0 = pneg %p935_p13 }
  0x1a   : > { %v271_v6 = vld [vmem:[%s270_s30] sm:$0xf]  ;;  %s799_s30 = sshll.u32 %s1003_s24, 4  ;;  %s1017_s24 = smov [#allocation2]  }
  0x1b   : > { %831 = vmatprep.subr.msk.mxu1 %vm292_vm1, %v271_v6  ;;  %821 = vmatpush3.msk.msra.mxu0 %vm292_vm1, %v271_v6  ;;  %s1185_s14 = scalar_lea.hbm %s1238_s6, %s799_s30  ;;  %s937_s17 = sshll.u32 %s1017_s24, 4  ;;  %s938_s17 = int_to_ptr.vmem [resolvable:$false] %s937_s17 }
  0x1c   : > { %832 = vmatpush3.msk.msra.mxu1 %vm292_vm1, %v271_v6  ;;  %688 = vperm.xlu0 %927, %v278_v12   ;;  %s939_s18 = scalar_lea.vmem %s938_s17, 32  ;;  %p940_p1 = scmp.lt.s32.totalorder %s1187_s11, %s938_s17 }
  0x1d   : > { %834 = vmatmul.mubr.msk.f32.vlgmr.msra.gmra.mrb[0].mxu1 %vm282_vm0, %v377_v7  ;;  %823 = vmatmul.mubr.msk.f32.vlgmr.msra.gmra.mrb[0].mxu0 %vm282_vm0, %v279_v13  ;;  %p941_p2 = scmp.lt.s32.totalorder %s939_s18, %s933_s16 }
  0x1e   : > { %836 = vmatprep.mubr.msk.f32.mxu1 %vm282_vm0, %v378_v8  ;;  %825 = vmatprep.mubr.msk.f32.mxu0 %vm1015_vm2, %v1014_v14 }
  0x1f   : > { %865 = vmatprep.subr.bf16.mxu0 %v1016_v45  ;;  %p942_p3 = por %p941_p2, %p940_p1 }
  0x21   : > { %837 = vmatmul.mubr.msk.f32.gmra.mrb[2].mxu1 %vm282_vm0, %v379_v11  ;;  %826 = vmatmul.mubr.msk.f32.gmra.mrb[2].mxu0 %vm282_vm0, %v280_v16  ;;  %p943_p5 = pnand %p942_p3, %p936_p0 }
  0x22   : > { %847 = vmatprep.mubr.msk.f32.mxu1 %vm511_vm3, %v509_v15  ;;  %828 = vmatprep.mubr.msk.f32.mxu0 %vm1015_vm2, %v1014_v14 }
  0x25   : > { %829 = vmatmul.mubr.msk.f32.gmra.mrb[4].mxu0 %vm282_vm0, %v281_v44 }
  0x26   : > { %854 = vmatprep.mubr.msk.f32.mxu0 %vm1015_vm2, %v1014_v14 }
  0x8f   : > { %v383_v17 = vpop.permute.xlu0 %382 }
  0x90   : > { %v393_v18 = vpop.permute.xlu1 %392 }
  0x93   : > { %v388_v19 = vpop.permute.xlu0 %387 }
  0x94   : > { %v398_v25 = vpop.permute.xlu1 %397 }
  0x97   : > { %v596_v51 = vpop.permute.xlu0 %595 }
  0x98   : > { %v601_v49 = vpop.permute.xlu1 %600 }
  0x9b   : > { %v689_v1 = vpop.permute.xlu0 %688 }
  0xf0   : > { %v835_v20 = vpop.f32.mrb[0].mxu1  ;;  %v362_v40 = vpop.f32.mrb[0].mxu0 }
  0xf1   : > { %v484_v21 = vadd.f32 %v835_v20, %v388_v19  ;;  %v478_v22 = vpop.f32.mrb[1].mxu1  ;;  %v824_v41 = vpop.f32.mrb[1].mxu0 }
  0xf2   : > { %v479_v23 = vadd.f32 %v478_v22, %v383_v17 }
  0xf3   : > { %vm498_vm4 = vcmp.gt.f32.partialorder %v484_v21, 0.0  ;;  %v502_v24 = vmul.f32 0.01, %v484_v21 }
  0xf4   : > { %vm497_vm5 = vcmp.gt.f32.partialorder %v479_v23, 0.0  ;;  %v501_v26 = vmul.f32 0.01, %v479_v23  ;;  %v838_v27 = vpop.f32.mrb[2].mxu1  ;;  %v367_v42 = vpop.f32.mrb[2].mxu0 }
  0xf5   : > { %v494_v28 = vadd.f32 %v838_v27, %v398_v25  ;;  %v488_v29 = vpop.f32.mrb[3].mxu1  ;;  %v506_v30 = vsel %vm498_vm4, %v484_v21, %v502_v24  ;;  %v827_v43 = vpop.f32.mrb[3].mxu0 }
  0xf6   : > { %v489_v31 = vadd.f32 %v488_v29, %v393_v18  ;;  %v505_v32 = vsel %vm497_vm5, %v479_v23, %v501_v26 }
  0xf7   : > { %vm500_vm6 = vcmp.gt.f32.partialorder %v494_v28, 0.0  ;;  %v504_v33 = vmul.f32 0.01, %v494_v28  ;;  %v857_v34 = vpack.c.bf16 %v506_v30, %v505_v32 }
  0xf8   : > { %vm499_vm7 = vcmp.gt.f32.partialorder %v489_v31, 0.0  ;;  %v503_v35 = vmul.f32 0.01, %v489_v31  ;;  %v372_v60 = vpop.f32.mrb[4].mxu0 }
  0xf9   : > { %858 = vmatprep.subr.bf16.mxu1 %v857_v34  ;;  %v508_v36 = vsel %vm500_vm6, %v494_v28, %v504_v33  ;;  %v830_v61 = vpop.f32.mrb[5].mxu0 }
  0xfa   : > { %860 = vmatpush3.bf16.msra.mxu1 %v857_v34  ;;  %v507_v37 = vsel %vm499_vm7, %v489_v31, %v503_v35 }
  0xfb   : > { %v861_v38 = vpack.c.bf16 %v508_v36, %v507_v37 }
  0xfd   : > { %862 = vmatprep.subr.bf16.mxu1 %v861_v38 }
  0xfe   : > { %864 = vmatpush3.bf16.msra.mxu1 %v861_v38 }
 0x101   : > { %848 = vmatmul.mubr.msk.f32.vlgmr.msra.gmra.mrb[4].mxu1 %vm511_vm3, %v510_v39 }
 0x1d4   : > { %v849_v46 = vpop.f32.mrb[4].mxu1 }
 0x1d5   : > { %v590_v47 = vadd.f32 %v849_v46, %v367_v42  ;;  %v584_v48 = vpop.f32.mrb[5].mxu1 }
 0x1d6   : > { %v585_v50 = vadd.f32 %v584_v48, %v362_v40 }
 0x1d7   : > { %v604_v52 = vadd.f32 %v601_v49, %v590_v47 }
 0x1d8   : > { %v603_v53 = vadd.f32 %v596_v51, %v585_v50 }
 0x1d9   : > { %vm606_vm8 = vcmp.gt.f32.partialorder %v604_v52, 0.0  ;;  %v608_v54 = vmul.f32 0.01, %v604_v52 }
 0x1da   : > { %vm605_vm9 = vcmp.gt.f32.partialorder %v603_v53, 0.0  ;;  %v607_v55 = vmul.f32 0.01, %v603_v53 }
 0x1db   : > { %v610_v56 = vsel %vm606_vm8, %v604_v52, %v608_v54 }
 0x1dc   : > { %v609_v57 = vsel %vm605_vm9, %v603_v53, %v607_v55 }
 0x1dd   : > { %v866_v58 = vpack.c.bf16 %v610_v56, %v609_v57 }
 0x1df   : > { %867 = vmatpush3.bf16.msra.mxu0 %v866_v58 }
 0x1e2   : > { %855 = vmatmul.mubr.msk.f32.vlgmr.msra.gmra.mrb[6].mxu0 %vm612_vm10, %v611_v59 }
 0x2b5   : > { %v682_v62 = vpop.f32.mrb[6].mxu0 }
 0x2b6   : > { %v683_v63 = vadd.f32 %v682_v62, %v372_v60  ;;  %v856_v0 = vpop.f32.mrb[7].mxu0 }
 0x2b8   : > { %v691_v2 = vadd.f32 %v689_v1, %v683_v63 }
 0x2ba   : > { %v798_v3 = vmul.f32 -1.442695, %v691_v2 }
 0x2bc   : > { %929 = vpow2.f32 %v798_v3 }
 0x2c6   : > { %v930_v4 = vpop.eup %929 }
 0x2c7   : > { %v695_v5 = vadd.f32 1.0, %v930_v4 }
 0x2c9   : > { %931 = vrcp.f32 %v695_v5 }
 0x2d3   : > { %v932_v6 = vpop.eup %931 }
 0x2d4   : > { %698 = vst [vmem:[%s263_s8] sm:$0x1] %v932_v6 }
 0x2d5   : > { %946 = shalt.err (!%p943_p5)
}
 0x2d6   : > { %s947_s19 = scalar_lea.hbm %s1185_s14, 16  ;;  %s951_s28 = scalar_lea.hbm %s1238_s6, 32 }
 0x2d7   : > { %p948_p6 = scmp.ne.s32.totalorder %s1185_s14, %s947_s19  ;;  %p952_p10 = scmp.lt.u32.totalorder %s1185_s14, %s1238_s6 }
 0x2d8   : > { %p953_p11 = scmp.lt.u32.totalorder %s951_s28, %s947_s19  ;;  %p955_p13 = scmp.lt.u32.totalorder %s947_s19, %s1185_s14 }
 0x2d9   : > { %p949_p7 = pnand %p948_p6, %p1093_p4 }
 0x2da   : > { %p954_p12 = por %p953_p11, %p952_p10 }
 0x2db   : > { %p950_p9 = pneg %p949_p7 }
 0x2dc   : > { %p956_p0 = por %p955_p13, %p954_p12 }
 0x2de   : > { %p957_p1 = pnand %p956_p0, %p950_p9 }
 0x2e0   : > { %960 = shalt.err (!%p957_p1)
}
 0x2e1   : > { %868 = dma.vmem_to_hbm [thread:$0]  (%p1093_p4), %s1187_s11, 16, %s1185_s14, %s700_s15  }
 0x2e2 PF: > { %p874_p2 = scmp.ge.s32.totalorder %s1011_s26, 2  ;;  %s725_s12 = sand.u32 1, %s991_s21  }
 0x2e3   : > { %s726_s13 = scalar_lea.sflag [#allocation3], %s725_s12 }
 0x2e4   : > { %p871_p3 = pnand %p874_p2, %p1100_p8 }
 0x2e6   : > { %986 = dma.done.wait (!%p871_p3), %s726_s13, 16  }
 0x2e7   : > { %988 = vsyncadd (!%p871_p3), %s726_s13, 4294967280  ;;  %s19_s26 = sadd.s32 1, %s1011_s26   ;;  %s1241_s21 = smov %s995_s22 }
 0x2e8   : > { %p16_p5 = scmp.ge.s32.totalorder %s19_s26, 4   ;;  %s1242_s22 = smov %s999_s23 }
 0x2e9   : > { %s1243_s23 = smov %s1106_s10  ;;  %s1244_s24 = smov %s1007_s25 }
 0x2ea   : > { %s1245_s25 = smov %s1247_s29  ;;  %18 = sbr.rel (!%p16_p5) target bundleno = 4 (0x4), region = 79 }
 0x2f1   :  { %730 = vsyncpa [#allocation3], 1 }
 0x2f2   :  { %732 = vsyncpa [#allocation3 + $0x1], 1 }

</bundles_post_ra>
